<compile_context>
chip_gen: v5e
topology: v5e:2x2
jax: 0.10.0
libtpu: 0.0.40
codegen_flags: <defaults>
</compile_context>

<pallas_src>
import functools
import math

import jax
import jax.numpy as jnp
from jax import lax
from jax.experimental import pallas as pl
from jax.experimental.pallas import tpu as pltpu

_INV_SQRT2 = 1.0 / math.sqrt(2.0)


def _round_up(a, b):
    return (a + b - 1) // b * b


def _cdiv(a, b):
    return (a + b - 1) // b


def _vmem_limit_bytes():
    """Device-derived VMEM limit: ~100 MiB on 128 MiB parts (v5e/v6e), ~48 MiB on v7x."""
    try:
        cap = int(pltpu.get_tpu_info().vmem_capacity_bytes)
    except Exception:  # API unavailable -> conservative (v7x-safe) default
        cap = 64 * 1024 * 1024
    return max(32 * 1024 * 1024, min(cap - 16 * 1024 * 1024, 100 * 1024 * 1024))


def _gelu_f32(y, approximate):
    if approximate:
        # tanh variant goes through the EUP slot (nearly free); NOT bit-parity
        # with torch's default erf GELU.
        return jax.nn.gelu(y, approximate=True)
    # Exact GELU (torch activation='gelu'): 0.5 * y * (1 + erf(y / sqrt(2)))
    return 0.5 * y * (1.0 + lax.erf(y * _INV_SQRT2))


def _ffn_gelu_kernel_single_k(x_ref, w_ref, b_ref, o_ref, *, approximate):
    # x_ref: [tm, Ep] bf16, w_ref: [Ep, tf] bf16 (pre-transposed),
    # b_ref: [1, tf] f32, o_ref: [tm, tf] out_dtype.
    # K collapsed -> no accumulator scratch, no per-K VMEM read-modify-write.
    y = jnp.dot(x_ref[...], w_ref[...], preferred_element_type=jnp.float32)
    y = y + b_ref[...]
    o_ref[...] = _gelu_f32(y, approximate).astype(o_ref.dtype)


def _ffn_gelu_kernel_multi_k(x_ref, w_ref, b_ref, o_ref, acc_ref, *, approximate):
    # Fallback for very large E: K reduction over grid axis 2 into an f32
    # VMEM accumulator, bias + GELU + cast epilogue at the last K step.
    k = pl.program_id(2)

    @pl.when(k == 0)
    def _():
        acc_ref[...] = jnp.zeros_like(acc_ref)

    acc_ref[...] += jnp.dot(x_ref[...], w_ref[...],
                            preferred_element_type=jnp.float32)

    @pl.when(k == pl.num_programs(2) - 1)
    def _():
        y = acc_ref[...] + b_ref[...]
        o_ref[...] = _gelu_f32(y, approximate).astype(o_ref.dtype)


def _select_tiles(M, F_dim, E, tm_target, tf_target, tk_target, out_bytes,
                  vmem_limit):
    """Pick (tm, tf, tk) and padded extents, budgeted against VMEM."""
    Fp0 = _round_up(F_dim, 128)
    Ep0 = _round_up(E, 128)

    # K axis: collapse to a single tile whenever possible.
    if Ep0 <= tk_target:
        n_k, tk = 1, Ep0
    else:
        n_k = _cdiv(Ep0, tk_target)
        tk = _round_up(_cdiv(Ep0, n_k), 128)
    Ep = tk * n_k

    # F tile (lane-dense, multiple of 128).
    tf = _round_up(min(tf_target, Fp0), 128)

    # Adaptive M tiling: choose tile count first, then the smallest 16-aligned
    # tm covering M, so padding never exceeds 15 rows per tile.
    n_m = max(1, _cdiv(M, tm_target))
    tm = _round_up(_cdiv(M, n_m), 16)

    def working_set(tm_, tf_, tk_):
        ws = 2 * (tm_ * tk_ * 2 + tk_ * tf_ * 2)   # double-buffered bf16 inputs
        ws += 2 * tm_ * tf_ * out_bytes            # double-buffered output
        ws += 2 * tf_ * 4                          # bias
        if n_k > 1:
            ws += tm_ * tf_ * 4                    # f32 accumulator scratch
        return ws

    budget = int(vmem_limit * 0.85)
    while working_set(tm, tf, tk) > budget and tf > 128:
        tf = _round_up(max(tf // 2, 128), 128)
    while working_set(tm, tf, tk) > budget and tm > 16:
        tm = _round_up(max(tm // 2, 16), 16)

    Fp = _round_up(Fp0, tf)
    n_f = Fp // tf
    n_m = _cdiv(M, tm)

    # If everything collapsed into one tile, split M in two so both TensorCores
    # of a v7x megacore (leading "parallel" axes) get work.
    if n_f * n_m == 1 and M >= 32:
        n_m = 2
        tm = _round_up(_cdiv(M, n_m), 16)

    Mp = tm * n_m
    return tm, tf, tk, Mp, Fp, Ep, n_k


def prepare_ffn_params(weight, bias):
    """One-time parameter prep (hoisted out of the per-call path).

    weight: [F, E] f32 (PyTorch nn.Linear layout) -> bf16, transposed to [E, F]
    and padded to 128-multiples.  bias: [F] f32 -> [1, Fp] f32.
    """
    F_dim, E = weight.shape
    Ep0 = _round_up(E, 128)
    Fp0 = _round_up(F_dim, 128)
    w_t = jnp.pad(weight.astype(jnp.bfloat16).T,
                  ((0, Ep0 - E), (0, Fp0 - F_dim)))
    b2d = jnp.pad(bias.astype(jnp.float32), (0, Fp0 - F_dim)).reshape(1, Fp0)
    return {"w_t": w_t, "b": b2d, "F": F_dim, "E": E}


def decoder_ffn_intermediate(x, params, *, tm_target=512, tf_target=2048,
                             tk_target=2048, out_dtype=jnp.bfloat16,
                             approximate_gelu=False):
    """Fused y = GELU(x @ W.T + b) with pre-prepared (bf16, transposed) W.

    x: [B, S, E] f32 activations.  Returns [B, S, F] in out_dtype
    (f32 accumulation + f32 GELU, single cast at the store).
    """
    B, S, E = x.shape
    F_dim = params["F"]
    assert E == params["E"], "activation width does not match prepared weight"
    M = B * S
    out_bytes = jnp.dtype(out_dtype).itemsize
    vmem_limit = _vmem_limit_bytes()

    tm, tf, tk, Mp, Fp, Ep, n_k = _select_tiles(
        M, F_dim, E, tm_target, tf_target, tk_target, out_bytes, vmem_limit)

    w_t, b2d = params["w_t"], params["b"]
    # Extra padding only if the tiling rounded beyond the 128-multiple prep pad.
    if w_t.shape != (Ep, Fp):
        w_t = jnp.pad(w_t, ((0, Ep - w_t.shape[0]), (0, Fp - w_t.shape[1])))
    if b2d.shape[1] != Fp:
        b2d = jnp.pad(b2d, ((0, 0), (0, Fp - b2d.shape[1])))

    # bf16 MXU input; zero padding contributes nothing to the contraction and
    # padded rows/cols are sliced away below.
    x2d = jnp.pad(x.reshape(M, E).astype(jnp.bfloat16),
                  ((0, Mp - M), (0, Ep - E)))

    n_f, n_m = Fp // tf, Mp // tm

    cost = pl.CostEstimate(
        flops=2 * M * F_dim * E,
        transcendentals=M * F_dim,
        bytes_accessed=(M * E * 2 + F_dim * E * 2
                        + M * F_dim * out_bytes + F_dim * 4),
    )

    if n_k == 1:
        kernel = functools.partial(_ffn_gelu_kernel_single_k,
                                   approximate=approximate_gelu)
        out2d = pl.pallas_call(
            kernel,
            out_shape=jax.ShapeDtypeStruct((Mp, Fp), out_dtype),
            grid_spec=pltpu.PrefetchScalarGridSpec(
                num_scalar_prefetch=0,
                grid=(n_f, n_m),  # F outer, M inner -> weight slab stays resident
                in_specs=[
                    pl.BlockSpec((tm, Ep), lambda j, i: (i, 0)),   # x
                    pl.BlockSpec((Ep, tf), lambda j, i: (0, j)),   # W.T [E, F]
                    pl.BlockSpec((1, tf), lambda j, i: (0, j)),    # bias
                ],
                out_specs=pl.BlockSpec((tm, tf), lambda j, i: (i, j)),
            ),
            compiler_params=pltpu.CompilerParams(
                dimension_semantics=("parallel", "parallel"),
                vmem_limit_bytes=vmem_limit,
            ),
            cost_estimate=cost,
        )(x2d, w_t, b2d)
    else:
        kernel = functools.partial(_ffn_gelu_kernel_multi_k,
                                   approximate=approximate_gelu)
        out2d = pl.pallas_call(
            kernel,
            out_shape=jax.ShapeDtypeStruct((Mp, Fp), out_dtype),
            grid_spec=pltpu.PrefetchScalarGridSpec(
                num_scalar_prefetch=0,
                grid=(n_f, n_m, n_k),  # K innermost ("arbitrary") reduction
                in_specs=[
                    pl.BlockSpec((tm, tk), lambda j, i, k: (i, k)),   # x
                    pl.BlockSpec((tk, tf), lambda j, i, k: (k, j)),   # W.T
                    pl.BlockSpec((1, tf), lambda j, i, k: (0, j)),    # bias
                ],
                out_specs=pl.BlockSpec((tm, tf), lambda j, i, k: (i, j)),
                scratch_shapes=[pltpu.VMEM((tm, tf), jnp.float32)],
            ),
            compiler_params=pltpu.CompilerParams(
                dimension_semantics=("parallel", "parallel", "arbitrary"),
                vmem_limit_bytes=vmem_limit,
            ),
            cost_estimate=cost,
        )(x2d, w_t, b2d)

    return out2d[:M, :F_dim].reshape(B, S, F_dim)


def _reference(x, weight, bias, *, bf16_inputs):
    """Plain-JAX reference: GELU(x @ W.T + b) with exact erf GELU."""
    B, S, E = x.shape
    xr = x.reshape(B * S, E)
    wr = weight
    if bf16_inputs:
        xr = xr.astype(jnp.bfloat16).astype(jnp.float32)
        wr = wr.astype(jnp.bfloat16).astype(jnp.float32)
    y = jnp.einsum("me,fe->mf", xr, wr, precision=lax.Precision.HIGHEST) + bias
    y = 0.5 * y * (1.0 + lax.erf(y * _INV_SQRT2))
    return y.reshape(B, S, weight.shape[0])


def _run_case(key, batch, seq, hidden, out_dtype=jnp.bfloat16, **kernel_kwargs):
    ff = hidden * 4  # dim_feedforward = hidden_size * 4 in DecoderTransformer
    kx, kw, kb = jax.random.split(key, 3)
    x = jax.random.normal(kx, (batch, seq, hidden), dtype=jnp.float32)
    bound = 1.0 / math.sqrt(hidden)
    weight = jax.random.uniform(kw, (ff, hidden), jnp.float32, -bound, bound)
    bias = jax.random.uniform(kb, (ff,), jnp.float32, -bound, bound)

    # One-time parameter prep (hoisted out of the per-call path).
    params = prepare_ffn_params(weight, bias)
    fn = jax.jit(lambda xx: decoder_ffn_intermediate(
        xx, params, out_dtype=out_dtype, **kernel_kwargs))

    out = fn(x)
    jax.block_until_ready(out)
    assert out.shape == (batch, seq, ff)
    assert out.dtype == out_dtype
    out_f32 = out.astype(jnp.float32)

    # Check vs. reference with the same bf16-rounded matmul inputs; kernel
    # additionally rounds the output (when bf16), hence ~1 bf16-ulp tolerance.
    ref_bf16 = _reference(x, weight, bias, bf16_inputs=True)
    assert jnp.allclose(out_f32, ref_bf16, atol=2e-2, rtol=2e-2), \
        float(jnp.max(jnp.abs(out_f32 - ref_bf16)))

    # Loose check vs. the full-f32 reference (covers bf16 rounding end-to-end).
    ref_f32 = _reference(x, weight, bias, bf16_inputs=False)
    assert jnp.allclose(out_f32, ref_f32, atol=5e-2, rtol=5e-2), \
        float(jnp.max(jnp.abs(out_f32 - ref_f32)))
    return out


if __name__ == "__main__":
    key = jax.random.PRNGKey(0)
    k1, k2, k3 = jax.random.split(key, 3)

    # Small shapes consistent with the module: [batch, seq, hidden], ff = 4*h.
    _run_case(k1, batch=2, seq=8, hidden=32)     # K collapsed, single-tile grid
    # Larger case: adaptive tm (M=320, zero over-padding), M split across two
    # "parallel" tiles, K still collapsed.
    _run_case(k2, batch=2, seq=160, hidden=256)
    # Force the multi-K accumulator fallback path (and f32 output) by capping
    # the K tile below Ep.
    _run_case(k3, batch=2, seq=8, hidden=256, out_dtype=jnp.float32,
              tk_target=128)

    print("KERNEL_OK")
</pallas_src>

<mosaic_0001>
module attributes {stable_mosaic.version = 11 : i64} {
  func.func @_ffn_gelu_kernel_single_k(%arg0: i32, %arg1: i32, %arg2: memref<16x128xbf16, #tpu.memory_space<vmem>>, %arg3: memref<128x128xbf16, #tpu.memory_space<vmem>>, %arg4: memref<1x128xf32, #tpu.memory_space<vmem>>, %arg5: memref<16x128xbf16, #tpu.memory_space<vmem>>) attributes {dimension_semantics = [#tpu.dimension_semantics<parallel>, #tpu.dimension_semantics<parallel>], iteration_bounds = array<i64: 1, 1>, scalar_prefetch = 0 : i64, scratch_operands = 0 : i64, tpu.core_type = #tpu.core_type<tc>, window_params = [{transform_indices = @transform_0, window_bounds = array<i64: 16, 128>}, {transform_indices = @transform_1, window_bounds = array<i64: 128, 128>}, {transform_indices = @transform_2, window_bounds = array<i64: 1, 128>}, {transform_indices = @transform_3, window_bounds = array<i64: 16, 128>}]} {
    %c0 = arith.constant 0 : index
    %c0_0 = arith.constant 0 : index
    %0 = vector.load %arg2[%c0, %c0_0] : memref<16x128xbf16, #tpu.memory_space<vmem>>, vector<16x128xbf16>
    %c0_1 = arith.constant 0 : index
    %c0_2 = arith.constant 0 : index
    %1 = vector.load %arg3[%c0_1, %c0_2] : memref<128x128xbf16, #tpu.memory_space<vmem>>, vector<128x128xbf16>
    %cst = arith.constant dense<0.000000e+00> : vector<16x128xf32>
    %2 = tpu.matmul %0, %1, %cst {dimension_numbers = #tpu.dot_dimension_numbers<[1], [0], [0], [1], [0, 0, 1, 1], [], []>} : vector<16x128xbf16>, vector<128x128xbf16>, vector<16x128xf32> -> vector<16x128xf32>
    %c0_3 = arith.constant 0 : index
    %c0_4 = arith.constant 0 : index
    %3 = vector.load %arg4[%c0_3, %c0_4] : memref<1x128xf32, #tpu.memory_space<vmem>>, vector<1x128xf32>
    %4 = vector.broadcast %3 : vector<1x128xf32> to vector<16x128xf32>
    %5 = arith.addf %2, %4 : vector<16x128xf32>
    %cst_5 = arith.constant 5.000000e-01 : f32
    %6 = vector.broadcast %cst_5 : f32 to vector<16x128xf32>
    %7 = arith.mulf %6, %5 : vector<16x128xf32>
    %cst_6 = arith.constant 0.707106769 : f32
    %8 = vector.broadcast %cst_6 : f32 to vector<16x128xf32>
    %9 = arith.mulf %5, %8 : vector<16x128xf32>
    %10 = math.erf %9 : vector<16x128xf32>
    %cst_7 = arith.constant 1.000000e+00 : f32
    %11 = vector.broadcast %cst_7 : f32 to vector<16x128xf32>
    %12 = arith.addf %11, %10 : vector<16x128xf32>
    %13 = arith.mulf %7, %12 : vector<16x128xf32>
    %14 = arith.truncf %13 : vector<16x128xf32> to vector<16x128xbf16>
    %c0_8 = arith.constant 0 : index
    %c0_9 = arith.constant 0 : index
    %15 = vector.load %arg5[%c0_8, %c0_9] : memref<16x128xbf16, #tpu.memory_space<vmem>>, vector<16x128xbf16>
    tpu.vector_store %arg5[%c0_8, %c0_9], %14 {strides = array<i32>} : memref<16x128xbf16, #tpu.memory_space<vmem>>, vector<16x128xbf16>,
    return
  }
  func.func @transform_0(%arg0: i32, %arg1: i32) -> (i32, i32) {
    %c0_i32 = arith.constant 0 : i32
    %c0_i32_0 = arith.constant 0 : i32
    return %arg1, %c0_i32 : i32, i32
  }
  func.func @transform_1(%arg0: i32, %arg1: i32) -> (i32, i32) {
    %c0_i32 = arith.constant 0 : i32
    %c0_i32_0 = arith.constant 0 : i32
    return %c0_i32, %arg0 : i32, i32
  }
  func.func @transform_2(%arg0: i32, %arg1: i32) -> (i32, i32) {
    %c0_i32 = arith.constant 0 : i32
    %c0_i32_0 = arith.constant 0 : i32
    return %c0_i32, %arg0 : i32, i32
  }
  func.func @transform_3(%arg0: i32, %arg1: i32) -> (i32, i32) {
    %c0_i32 = arith.constant 0 : i32
    return %arg1, %arg0 : i32, i32
  }
}

</mosaic_0001>

<bundles_post_ra>
// kernel: _lambda_.1
= control target key start
LH: loop header
LB: loop body
LE: loop exit
PB: predicated region body
PF: predicated region fallthrough
CT: control target
= control target key end

     0   :  { %8 = vsyncpa [#allocation3], 0  ;;  %s405_s0 = inlined_call_operand.vmem [shape: bf16[16,128], index: 0, kind: input, shape index: {}]   ;;  %s406_s1 = inlined_call_operand.hbm [shape: bf16[128,128], index: 1, kind: input, shape index: {}]   ;;  %s407_s2 = inlined_call_operand.vmem [shape: f32[1,128], index: 2, kind: input, shape index: {}]   ;;  %s408_s3 = inlined_call_operand.hbm [shape: bf16[16,128], index: 3, kind: output, shape index: {}]  }
   0x1   :  { %9 = vsyncpa [#allocation4], 0  ;;  %s16_s14 = sshll.u32 %s406_s1, 4  ;;  %s345_s15 = smov [#allocation2]   ;;  %s17_s14 = int_to_ptr.hbm [resolvable:$true] %s16_s14 }
   0x2   :  { %s18_s16 = sshll.u32 %s345_s15, 4  ;;  %s346_s17 = smov 64   ;;  %s19_s16 = int_to_ptr.vmem [resolvable:$true] %s18_s16 }
   0x3   :  { %s347_s18 = smov 4  }
   0x4   :  { %24 = dma.hbm_to_vmem [thread:$0]  %s17_s14, 1024, %s19_s16, [#allocation3], %s346_s17, %s346_s17, %s347_s18  }
   0x5   :  { %341 = dma.done.wait [#allocation3], 1024  }
   0x6   :  { %342 = vsyncadd [#allocation3], 4294966272  ;;  %v278_v0 = vld [vmem:[#allocation2 + $0x38] sm:$0xff]  ;;  %v277_v1 = vld [vmem:[#allocation2 + $0x30] sm:$0xff]  ;;  %s219_s24 = sshll.u32 %s408_s3, 4  ;;  %s220_s24 = int_to_ptr.hbm [resolvable:$true] %s219_s24 }
   0x7   :  { %107 = vmatpush.bf16.msra.mxu0 %v278_v0  ;;  %v276_v2 = vld [vmem:[#allocation2 + $0x28] sm:$0xff]  ;;  %v275_v3 = vld [vmem:[#allocation2 + $0x20] sm:$0xff]  ;;  %v274_v4 = vld [vmem:[#allocation2 + $0x18] sm:$0xff] }
   0x8   :  { %v273_v5 = vld [vmem:[#allocation2 + $0x10] sm:$0xff]  ;;  %v272_v6 = vld [vmem:[#allocation2 + $0x8] sm:$0xff]  ;;  %v271_v7 = vld [vmem:[#allocation2] sm:$0xff] }
   0x9   :  { %v270_v8 = vld [vmem:[%s405_s0] sm:$0xff]  ;;  %s348_s0 = smov [#allocation5]  }
   0xa   :  { %v288_v9 = vld [vmem:[%s407_s2] ss:$0 sm:$0xff]  ;;  %s217_s2 = sshll.u32 %s348_s0, 4  ;;  %s218_s2 = int_to_ptr.vmem [resolvable:$true] %s217_s2 }
   0xb   :  { %108 = vmatpush.bf16.msra.mxu0 %v277_v1 }
   0xf   :  { %109 = vmatpush.bf16.msra.mxu0 %v276_v2 }
  0x13   :  { %110 = vmatpush.bf16.msra.mxu0 %v275_v3 }
  0x17   :  { %111 = vmatpush.bf16.msra.mxu0 %v274_v4 }
  0x1b   :  { %112 = vmatpush.bf16.msra.mxu0 %v273_v5 }
  0x1f   :  { %113 = vmatpush.bf16.msra.mxu0 %v272_v6 }
  0x23   :  { %114 = vmatpush.bf16.msra.mxu0 %v271_v7 }
  0x26   :  { %115 = vmatmul.bf16.vlgmr.msra.gmra.mxu0 %v270_v8 }
  0xa3   :  { %v116_v10 = vpop.f32.mrf.mxu0 }
  0xa4   :  { %v381_v11 = vadd.f32 %v288_v9, %v116_v10 }
  0xa6   :  { %v384_v12 = vmul.f32 0.70710677, %v381_v11 }
  0xa8   :  { %v125_v13 = vmul.f32 %v384_v12, %v384_v12 }
  0xaa   :  { %v126_v14 = vmin.f32 %v125_v13, 16.0 }
  0xab   :  { %v118_v15 = vpop.f32.mrf.mxu0 }
  0xac   :  { %v127_v16 = vmul.f32 2.1237322e-06, %v126_v14  ;;  %v138_v17 = vmul.f32 3.8918573e-05, %v126_v14  ;;  %v388_v18 = vadd.f32 %v288_v9, %v118_v15 }
  0xae   :  { %v128_v19 = vadd.f32 0.00028619796, %v127_v16  ;;  %v139_v20 = vadd.f32 0.001143296, %v138_v17  ;;  %v391_v21 = vmul.f32 0.70710677, %v388_v18 }
  0xb0   :  { %v140_v22 = vmul.f32 %v139_v20, %v126_v14  ;;  %v165_v23 = vmul.f32 %v391_v21, %v391_v21  ;;  %v129_v24 = vmul.f32 %v128_v19, %v126_v14 }
  0xb2   :  { %v141_v25 = vadd.f32 0.014752088, %v140_v22  ;;  %v166_v26 = vmin.f32 %v165_v23, 16.0  ;;  %v130_v30 = vadd.f32 0.0036580483, %v129_v24 }
  0xb4   :  { %v142_v27 = vmul.f32 %v141_v25, %v126_v14  ;;  %v167_v28 = vmul.f32 2.1237322e-06, %v166_v26  ;;  %v178_v29 = vmul.f32 3.8918573e-05, %v166_v26  ;;  %v131_v37 = vmul.f32 %v130_v30, %v126_v14 }
  0xb6   :  { %v143_v31 = vadd.f32 0.112945676, %v142_v27  ;;  %v168_v32 = vadd.f32 0.00028619796, %v167_v28  ;;  %v179_v33 = vadd.f32 0.001143296, %v178_v29 }
  0xb7   :  { %v132_v43 = vadd.f32 0.05243302, %v131_v37  ;;  %v122_v27 = vmul.f32 0.5, %v388_v18 }
  0xb8   :  { %v144_v34 = vmul.f32 %v143_v31, %v126_v14  ;;  %v169_v35 = vmul.f32 %v168_v32, %v166_v26  ;;  %v180_v36 = vmul.f32 %v179_v33, %v166_v26 }
  0xb9   :  { %v133_v48 = vmul.f32 %v132_v43, %v126_v14 }
  0xba   :  { %v145_v38 = vadd.f32 0.4994258, %v144_v34  ;;  %v170_v39 = vadd.f32 0.0036580483, %v169_v35  ;;  %v181_v40 = vadd.f32 0.014752088, %v180_v36 }
  0xbb   :  { %v134_v53 = vadd.f32 0.18741608, %v133_v48 }
  0xbc   :  { %v146_v41 = vmul.f32 %v145_v38, %v126_v14  ;;  %v182_v42 = vmul.f32 %v181_v40, %v166_v26  ;;  %v171_v45 = vmul.f32 %v170_v39, %v166_v26 }
  0xbd   :  { %v135_v58 = vmul.f32 %v134_v53, %v126_v14 }
  0xbe   :  { %v147_v44 = vadd.f32 1.0, %v146_v41  ;;  %v183_v46 = vadd.f32 0.112945676, %v182_v42  ;;  %v172_v49 = vadd.f32 0.05243302, %v171_v45 }
  0xbf   :  { %v136_v0 = vadd.f32 1.1283791, %v135_v58 }
  0xc0   :  { %289 = vrcp.f32 %v147_v44  ;;  %v184_v47 = vmul.f32 %v183_v46, %v166_v26  ;;  %v173_v55 = vmul.f32 %v172_v49, %v166_v26  ;;  %v159_v60 = vand.u32 2147483648, %v147_v44 }
  0xc1   :  { %v157_v62 = vand.u32 2147483647, %v147_v44  ;;  %vm153_vm1 = vweird.f32 %v147_v44  ;;  %v137_v7 = vmul.f32 %v136_v0, %v384_v12 }
  0xc2   :  { %v185_v50 = vadd.f32 0.4994258, %v184_v47  ;;  %v174_v61 = vadd.f32 0.18741608, %v173_v55  ;;  %v160_v3 = vor.u32 1.1754944e-38, %v159_v60 }
  0xc3   :  { %vm158_vm3 = vcmp.eq.f32.partialorder %v157_v62, 8.507059e+37 }
  0xc4   :  { %v186_v51 = vmul.f32 %v185_v50, %v166_v26  ;;  %v175_v4 = vmul.f32 %v174_v61, %v166_v26  ;;  %v121_v26 = vmul.f32 0.5, %v381_v11 }
  0xc6   :  { %v290_v52 = vpop.eup %289  ;;  %v187_v56 = vadd.f32 1.0, %v186_v51  ;;  %v176_v9 = vadd.f32 1.1283791, %v175_v4 }
  0xc7   :  { %v149_v54 = vmul.f32 %v290_v52, %v147_v44  ;;  %vm154_vm0 = vweird.f32 %v290_v52 }
  0xc8   :  { %291 = vrcp.f32 %v187_v56  ;;  %vm155_vm2 = vmor %vm153_vm1, %vm154_vm0  ;;  %v199_v10 = vand.u32 2147483648, %v187_v56  ;;  %v197_v15 = vand.u32 2147483647, %v187_v56  ;;  %vm193_vm5 = vweird.f32 %v187_v56 }
  0xc9   :  { %v150_v57 = vsub.f32 1.0, %v149_v54  ;;  %v177_v20 = vmul.f32 %v176_v9, %v391_v21 }
  0xca   :  { %v200_v17 = vor.u32 1.1754944e-38, %v199_v10  ;;  %vm198_vm7 = vcmp.eq.f32.partialorder %v197_v15, 8.507059e+37 }
  0xcb   :  { %v151_v59 = vmul.f32 %v290_v52, %v150_v57 }
  0xcd   :  { %v152_v63 = vadd.f32 %v290_v52, %v151_v59 }
  0xce   :  { %v292_v1 = vpop.eup %291 }
  0xcf   :  { %v156_v2 = vsel %vm155_vm2, %v290_v52, %v152_v63  ;;  %v189_v5 = vmul.f32 %v292_v1, %v187_v56  ;;  %vm194_vm4 = vweird.f32 %v292_v1 }
  0xd0   :  { %v161_v6 = vsel %vm158_vm3, %v160_v3, %v156_v2  ;;  %vm195_vm6 = vmor %vm193_vm5, %vm194_vm4 }
  0xd1   :  { %v190_v8 = vsub.f32 1.0, %v189_v5  ;;  %v162_v13 = vmul.f32 %v161_v6, %v137_v7 }
  0xd3   :  { %v191_v14 = vmul.f32 %v292_v1, %v190_v8  ;;  %v268_v19 = vclamps-f32 %v162_v13, 1.0 }
  0xd5   :  { %v192_v16 = vadd.f32 %v292_v1, %v191_v14  ;;  %v205_v25 = vadd.f32 1.0, %v268_v19 }
  0xd7   :  { %v196_v22 = vsel %vm195_vm6, %v292_v1, %v192_v16  ;;  %v207_v29 = vmul.f32 %v205_v25, %v121_v26 }
  0xd8   :  { %v201_v23 = vsel %vm198_vm7, %v200_v17, %v196_v22 }
  0xd9   :  { %v202_v24 = vmul.f32 %v201_v23, %v177_v20 }
  0xdb   :  { %v269_v12 = vclamps-f32 %v202_v24, 1.0 }
  0xdd   :  { %v206_v28 = vadd.f32 1.0, %v269_v12 }
  0xdf   :  { %v208_v30 = vmul.f32 %v206_v28, %v122_v27 }
  0xe1   :  { %v282_v21 = vpack.c.bf16 %v208_v30, %v207_v29 }
  0xe3   :  { %283 = vst [vmem:[#allocation5] sm:$0xff] %v282_v21  }
  0xe4   :  { %225 = dma.vmem_to_hbm [thread:$0]  %s218_s2, 128, %s220_s24, [#allocation4], %s346_s17, %s346_s17, %s347_s18  }
  0xe5   :  { %343 = dma.done.wait [#allocation4], 128  }
  0xe6   :  { %344 = vsyncadd [#allocation4], 4294967168 }
  0xe7   :  { %230 = vsyncpa [#allocation3], 1 }
  0xe8   :  { %231 = vsyncpa [#allocation4], 1 }

</bundles_post_ra>
